<compile_context>
chip_gen: v7x
topology: tpu7x:2x2x1
jax: 0.10.0
libtpu: 0.0.40
codegen_flags: <defaults>
</compile_context>

<pallas_src>
import jax
import jax.numpy as jnp
from jax.experimental import pallas as pl
from jax.experimental.pallas import tpu as pltpu


def _round_up(x, m):
    return ((x + m - 1) // m) * m


def _matmul4d_kernel(lhs_ref, rhs_ref, out_ref, acc_ref):
    # lhs_ref: (tm, tk), rhs_ref: (tk, tn), out_ref: (tm, tn)  (batch dims squeezed)
    k = pl.program_id(4)

    @pl.when(k == 0)
    def _():
        acc_ref[...] = jnp.zeros_like(acc_ref)

    acc_ref[...] += jnp.dot(
        lhs_ref[...], rhs_ref[...], preferred_element_type=jnp.float32
    )

    @pl.when(k == pl.num_programs(4) - 1)
    def _():
        out_ref[...] = acc_ref[...].astype(out_ref.dtype)


def matmul4d(lhs, rhs):
    """Batched 4-D matmul: (B1,B2,M,K) @ (B1,B2,K,N) -> (B1,B2,M,N)."""
    assert lhs.ndim == 4 and rhs.ndim == 4
    B1, B2, M, K = lhs.shape
    rB1, rB2, rK, N = rhs.shape
    assert (B1, B2, K) == (rB1, rB2, rK), "batch / contraction dims must match"

    out_dtype = jnp.result_type(lhs.dtype, rhs.dtype)

    # MXU-aligned, lane-dense tiles; modest enough to fit v7x's smaller VMEM.
    tm = min(256, _round_up(M, 128))
    tn = min(256, _round_up(N, 128))
    tk = min(512, _round_up(K, 128))

    Mp = _round_up(M, tm)
    Np = _round_up(N, tn)
    Kp = _round_up(K, tk)

    # Zero-pad to tile multiples (zeros in K contribute nothing to the dot).
    if (Mp, Kp) != (M, K):
        lhs = jnp.pad(lhs, ((0, 0), (0, 0), (0, Mp - M), (0, Kp - K)))
    if (Kp, Np) != (K, N):
        rhs = jnp.pad(rhs, ((0, 0), (0, 0), (0, Kp - K), (0, Np - N)))

    gm, gn, gk = Mp // tm, Np // tn, Kp // tk
    grid = (B1, B2, gm, gn, gk)

    flops = 2 * B1 * B2 * Mp * Np * Kp
    bytes_accessed = (
        lhs.size * lhs.dtype.itemsize
        + rhs.size * rhs.dtype.itemsize
        + B1 * B2 * Mp * Np * jnp.dtype(out_dtype).itemsize
    )

    out_padded = pl.pallas_call(
        _matmul4d_kernel,
        out_shape=jax.ShapeDtypeStruct((B1, B2, Mp, Np), out_dtype),
        grid_spec=pltpu.PrefetchScalarGridSpec(
            num_scalar_prefetch=0,
            grid=grid,
            in_specs=[
                pl.BlockSpec(
                    (pl.Squeezed(), pl.Squeezed(), tm, tk),
                    lambda b1, b2, i, j, k: (b1, b2, i, k),
                ),
                pl.BlockSpec(
                    (pl.Squeezed(), pl.Squeezed(), tk, tn),
                    lambda b1, b2, i, j, k: (b1, b2, k, j),
                ),
            ],
            out_specs=pl.BlockSpec(
                (pl.Squeezed(), pl.Squeezed(), tm, tn),
                lambda b1, b2, i, j, k: (b1, b2, i, j),
            ),
            scratch_shapes=[pltpu.VMEM((tm, tn), jnp.float32)],
        ),
        compiler_params=pltpu.CompilerParams(
            dimension_semantics=(
                "parallel",
                "parallel",
                "parallel",
                "parallel",
                "arbitrary",  # K reduction axis, trailing
            ),
        ),
        cost_estimate=pl.CostEstimate(
            flops=flops, transcendentals=0, bytes_accessed=bytes_accessed
        ),
    )(lhs, rhs)

    if (Mp, Np) != (M, N):
        out_padded = out_padded[:, :, :M, :N]
    return out_padded


if __name__ == "__main__":
    # Small shapes consistent with the module's 4-D matmul semantics.
    B1, B2, M, K, N = 2, 4, 16, 32, 16

    key = jax.random.PRNGKey(0)
    k_lhs, k_rhs = jax.random.split(key)
    lhs = jax.random.normal(k_lhs, (B1, B2, M, K), dtype=jnp.float32)
    rhs = jax.random.normal(k_rhs, (B1, B2, K, N), dtype=jnp.float32)

    out = matmul4d(lhs, rhs)
    out = jax.block_until_ready(out)

    # Correctness check against plain JAX batched matmul (torch.matmul semantics).
    ref = jnp.matmul(lhs, rhs)
    assert out.shape == (B1, B2, M, N)
    assert out.dtype == ref.dtype
    assert jnp.allclose(out, ref, atol=1e-4, rtol=1e-4)

    print("KERNEL_OK")
</pallas_src>

<mosaic_0001>
module attributes {stable_mosaic.version = 11 : i64} {
  func.func @_matmul4d_kernel(%arg0: i32, %arg1: i32, %arg2: i32, %arg3: i32, %arg4: i32, %arg5: memref<1x1x128x128xf32, #tpu.memory_space<vmem>>, %arg6: memref<1x1x128x128xf32, #tpu.memory_space<vmem>>, %arg7: memref<1x1x128x128xf32, #tpu.memory_space<vmem>>, %arg8: memref<128x128xf32, #tpu.memory_space<vmem>>) attributes {dimension_semantics = [#tpu.dimension_semantics<parallel>, #tpu.dimension_semantics<parallel>, #tpu.dimension_semantics<parallel>, #tpu.dimension_semantics<parallel>, #tpu.dimension_semantics<arbitrary>], iteration_bounds = array<i64: 2, 4, 1, 1, 1>, scalar_prefetch = 0 : i64, scratch_operands = 1 : i64, tpu.core_type = #tpu.core_type<tc>, window_params = [{transform_indices = @transform_0, window_bounds = array<i64: 1, 1, 128, 128>}, {transform_indices = @transform_1, window_bounds = array<i64: 1, 1, 128, 128>}, {transform_indices = @transform_2, window_bounds = array<i64: 1, 1, 128, 128>}]} {
    %c0_i32 = arith.constant 0 : i32
    %0 = arith.cmpi eq, %arg4, %c0_i32 : i32
    %1 = arith.extui %0 : i1 to i32
    %c0_i32_0 = arith.constant 0 : i32
    %2 = arith.cmpi ne, %1, %c0_i32_0 : i32
    scf.if %2 {
      %cst_14 = arith.constant 0.000000e+00 : f32
      %14 = vector.broadcast %cst_14 : f32 to vector<128x128xf32>
      %c0_15 = arith.constant 0 : index
      %c0_16 = arith.constant 0 : index
      %15 = vector.load %arg8[%c0_15, %c0_16] : memref<128x128xf32, #tpu.memory_space<vmem>>, vector<128x128xf32>
      tpu.vector_store %arg8[%c0_15, %c0_16], %14 {strides = array<i32>} : memref<128x128xf32, #tpu.memory_space<vmem>>, vector<128x128xf32>,
    } else {
    }
    %c0 = arith.constant 0 : index
    %c0_1 = arith.constant 0 : index
    %3 = vector.load %arg8[%c0, %c0_1] : memref<128x128xf32, #tpu.memory_space<vmem>>, vector<128x128xf32>
    %c0_2 = arith.constant 0 : index
    %c0_3 = arith.constant 0 : index
    %c0_4 = arith.constant 0 : index
    %c0_5 = arith.constant 0 : index
    %4 = vector.load %arg5[%c0_2, %c0_3, %c0_4, %c0_5] : memref<1x1x128x128xf32, #tpu.memory_space<vmem>>, vector<1x1x128x128xf32>
    %5 = vector.shape_cast %4 : vector<1x1x128x128xf32> to vector<128x128xf32>
    %c0_6 = arith.constant 0 : index
    %c0_7 = arith.constant 0 : index
    %c0_8 = arith.constant 0 : index
    %c0_9 = arith.constant 0 : index
    %6 = vector.load %arg6[%c0_6, %c0_7, %c0_8, %c0_9] : memref<1x1x128x128xf32, #tpu.memory_space<vmem>>, vector<1x1x128x128xf32>
    %7 = vector.shape_cast %6 : vector<1x1x128x128xf32> to vector<128x128xf32>
    %cst = arith.constant dense<0.000000e+00> : vector<128x128xf32>
    %8 = tpu.matmul %5, %7, %cst {dimension_numbers = #tpu.dot_dimension_numbers<[1], [0], [0], [1], [0, 0, 1, 1], [], []>} : vector<128x128xf32>, vector<128x128xf32>, vector<128x128xf32> -> vector<128x128xf32>
    %9 = arith.addf %3, %8 : vector<128x128xf32>
    %c0_10 = arith.constant 0 : index
    %c0_11 = arith.constant 0 : index
    %10 = vector.load %arg8[%c0_10, %c0_11] : memref<128x128xf32, #tpu.memory_space<vmem>>, vector<128x128xf32>
    tpu.vector_store %arg8[%c0_10, %c0_11], %9 {strides = array<i32>} : memref<128x128xf32, #tpu.memory_space<vmem>>, vector<128x128xf32>,
    %c0_i32_12 = arith.constant 0 : i32
    %11 = arith.cmpi eq, %arg4, %c0_i32_12 : i32
    %12 = arith.extui %11 : i1 to i32
    %c0_i32_13 = arith.constant 0 : i32
    %13 = arith.cmpi ne, %12, %c0_i32_13 : i32
    scf.if %13 {
      %c0_14 = arith.constant 0 : index
      %c0_15 = arith.constant 0 : index
      %14 = vector.load %arg8[%c0_14, %c0_15] : memref<128x128xf32, #tpu.memory_space<vmem>>, vector<128x128xf32>
      %c0_16 = arith.constant 0 : index
      %c0_17 = arith.constant 0 : index
      %c0_18 = arith.constant 0 : index
      %c0_19 = arith.constant 0 : index
      %15 = vector.load %arg7[%c0_16, %c0_17, %c0_18, %c0_19] : memref<1x1x128x128xf32, #tpu.memory_space<vmem>>, vector<1x1x128x128xf32>
      %16 = vector.shape_cast %15 : vector<1x1x128x128xf32> to vector<128x128xf32>
      %17 = vector.shape_cast %14 : vector<128x128xf32> to vector<1x1x128x128xf32>
      tpu.vector_store %arg7[%c0_16, %c0_17, %c0_18, %c0_19], %17 {strides = array<i32>} : memref<1x1x128x128xf32, #tpu.memory_space<vmem>>, vector<1x1x128x128xf32>,
    } else {
    }
    return
  }
  func.func @transform_0(%arg0: i32, %arg1: i32, %arg2: i32, %arg3: i32, %arg4: i32) -> (i32, i32, i32, i32) {
    %c0_i32 = arith.constant 0 : i32
    return %arg0, %arg1, %arg2, %arg4 : i32, i32, i32, i32
  }
  func.func @transform_1(%arg0: i32, %arg1: i32, %arg2: i32, %arg3: i32, %arg4: i32) -> (i32, i32, i32, i32) {
    %c0_i32 = arith.constant 0 : i32
    return %arg0, %arg1, %arg4, %arg3 : i32, i32, i32, i32
  }
  func.func @transform_2(%arg0: i32, %arg1: i32, %arg2: i32, %arg3: i32, %arg4: i32) -> (i32, i32, i32, i32) {
    %c0_i32 = arith.constant 0 : i32
    return %arg0, %arg1, %arg2, %arg3 : i32, i32, i32, i32
  }
}

</mosaic_0001>

<bundles_post_ra>
// kernel: tpu_custom_call.1
= control target key start
LH: loop header
LB: loop body
LE: loop exit
PB: predicated region body
PF: predicated region fallthrough
CT: control target
= control target key end

     0   :  { %s1449_s0 = inlined_call_operand.hbm [shape: f32[2,4,128,128], index: 0, kind: input, shape index: {}]   ;;  %s1450_s1 = inlined_call_operand.hbm [shape: f32[2,4,128,128], index: 1, kind: input, shape index: {}]   ;;  %s1451_s2 = inlined_call_operand.hbm [shape: f32[2,4,128,128], index: 2, kind: output, shape index: {}]  }
   0x1   :  { %1456 = sst [smem:[#allocation13_spill]] %s1449_s0 }
   0x2   :  { %7 = vsyncpa [#allocation4], 0 }
   0x3   :  { %9 = vsyncpa [#allocation4 + $0x1], 0 }
   0x4   :  { %10 = vsyncpa [#allocation7], 0 }
   0x5   :  { %12 = vsyncpa [#allocation7 + $0x1], 0 }
   0x6   :  { %13 = vsyncpa [#allocation5], 0 }
   0x7   :  { %15 = vsyncpa [#allocation5 + $0x1], 0  ;;  %s1130_s9 = smov 0   ;;  %s1132_s10 = smov 0  }
   0x8   :  { %s1134_s11 = smov 0   ;;  %s1136_s12 = smov 0  }
   0x9   :  { %s1138_s13 = smov 0   ;;  %s1140_s14 = smov 0  }
   0xa   :  { %s1142_s15 = smov 0   ;;  %s1144_s16 = smov 0  }
   0xb LB: > { %s699_s17 = sadd.s32 4294967295, %s1106_s16   ;;  %s700_s18 = sadd.s32 4294967294, %s1106_s16   ;;  %s1106_s16 = sphi %s1144_s16, %s21_s16   ;;  %s1102_s15 = sphi %s1142_s15, %s1476_s15   ;;  %s1098_s14 = sphi %s1140_s14, %s1475_s14   ;;  %s1094_s13 = sphi %s1138_s13, %s1474_s13   ;;  %s1090_s12 = sphi %s1136_s12, %s1473_s12   ;;  %s1086_s11 = sphi %s1134_s11, %s1472_s11   ;;  %s1082_s10 = sphi %s1132_s10, %s1471_s10   ;;  %s1078_s9 = sphi %s1130_s9, %s1470_s9  }
   0xc   : > { %s50_s19 = sadd.s32 1, %s1098_s14  ;;  %s54_s20 = sadd.s32 1, %s1102_s15 }
   0xd   : > { %p52_p0 = scmp.ge.s32.totalorder %s50_s19, 4  ;;  %s67_s21 = sadd.s32 1, %s1086_s11 }
   0xe   : > { %p74_p1 = scmp.ne.s32.totalorder %s1086_s11, %s1082_s10  ;;  %p75_p2 = scmp.eq.s32.totalorder %s1106_s16, 0 }
   0xf   : > { %s1478_s19 = smov (%p52_p0, %s50_s19), 0  ;;  %s1480_s20 = smov (!%p52_p0, %s54_s20), %s1102_s15 }
  0x10   : > { %s59_s22 = ssub.s32 %s1098_s14, %s1478_s19  ;;  %p1183_p3 = por %p75_p2, %p74_p1 }
  0x11   : > { %p56_p4 = scmp.ge.s32.totalorder %s1480_s20, 2  ;;  %p80_p5 = scmp.ne.s32.totalorder %s1082_s10, %s1078_s9 }
  0x12   : > { %p81_p6 = scmp.eq.s32.totalorder %s699_s17, 0  ;;  %p142_p7 = scmp.eq.s32.totalorder %s699_s17, 7 }
  0x13   : > { %s1482_s20 = smov (%p56_p4, %s1480_s20), 0  ;;  %p148_p10 = scmp.eq.s32.totalorder %s700_s18, 7 }
  0x14   : > { %1458 = sst [smem:[#allocation12_spill]] %s1482_s20  ;;  %p1191_p8 = por %p81_p6, %p80_p5 }
  0x15   : > { %p1195_p9 = por %p142_p7, %p74_p1  ;;  %s58_s26 = ssub.s32 %s1102_s15, %s1482_s20 }
  0x16   : > { %s1459_s24 = scalar_select %p1191_p8, 1, 0 }
  0x17   : > { %s1460_s25 = scalar_select %p1195_p9, 1, 0 }
  0x18   : > { %s60_s27 = sor.u32 %s59_s22, %s58_s26  ;;  %p1201_p12 = por %p148_p10, %p80_p5 }
  0x19   : > { %p65_p11 = scmp.eq.s32.totalorder %s60_s27, 0  ;;  %p874_p13 = scmp.lt.s32.totalorder %s1106_s16, 8 }
  0x1a   : > { %s1461_s28 = scalar_select %p1201_p12, 1, 0 }
  0x1b   : > { %s1207_s29 = sand.u32 1, %s1086_s11   ;;  %s704_s4 = sshll.u32 %s1098_s14, 4 }
  0x1c   : > { %s1210_s30 = scalar_select %p65_p11, %s1086_s11, %s67_s21  }
  0x1d   : > { %s1452_s3 = sshll.u32 %s1207_s29, 7  ;;  %s705_s5 = sshll.u32 %s1102_s15, 6 }
  0x1e   : > { %s172_s6 = scalar_lea.vmem [#allocation3], %s1452_s3  ;;  %s1217_s8 = sadd.s32 %s705_s5, %s704_s4 }
  0x1f   : > { %s184_s7 = sshll.u32 %s172_s6, 4  ;;  %s706_s17 = sshll.u32 %s1217_s8, 7  ;;  %s1219_s7 = int_to_ptr.vmem [resolvable:$true] %s184_s7 }
  0x20   : > { %p1224_p0 = pnand %p874_p13, %p1183_p3  ;;  %s1463_s0 = sld [smem:[#allocation13_spill]] }
  0x21   : > { %s169_s27 = scalar_lea.sflag [#allocation4], %s1207_s29 }
  0x22   : > { %p946_p2 = pneg %p1224_p0 }
  0x26   : > { %s1233_s26 = scalar_lea.hbm %s1463_s0, %s706_s17  ;;  %s949_s6 = scalar_lea.hbm %s1463_s0, 16384 }
  0x27   : > { %s944_s4 = scalar_lea.hbm %s1233_s26, 2048  ;;  %p950_p5 = scmp.lt.u32.totalorder %s1233_s26, %s1463_s0 }
  0x28   : > { %p945_p1 = scmp.ne.s32.totalorder %s1233_s26, %s944_s4  ;;  %p951_p6 = scmp.lt.u32.totalorder %s949_s6, %s944_s4 }
  0x29   : > { %p953_p10 = scmp.lt.u32.totalorder %s944_s4, %s1233_s26 }
  0x2a   : > { %p947_p3 = pnand %p946_p2, %p945_p1  ;;  %p952_p7 = por %p951_p6, %p950_p5 }
  0x2c   : > { %p948_p4 = pneg %p947_p3  ;;  %p954_p11 = por %p953_p10, %p952_p7 }
  0x2e   : > { %p955_p13 = pnand %p954_p11, %p948_p4 }
  0x30   : > { %958 = shalt.err (!%p955_p13)
}
  0x31   : > { %s959_s3 = scalar_lea.vmem %s1219_s7, 2048  ;;  %s1108_s23 = smov [#allocation3]  }
  0x32   : > { %p960_p1 = scmp.ne.s32.totalorder %s1219_s7, %s959_s3  ;;  %s964_s5 = sshll.u32 %s1108_s23, 4  ;;  %s965_s5 = int_to_ptr.vmem [resolvable:$false] %s964_s5 }
  0x33   : > { %s966_s21 = scalar_lea.vmem %s965_s5, 4096  ;;  %p967_p9 = scmp.lt.s32.totalorder %s1219_s7, %s965_s5 }
  0x34   : > { %p962_p3 = pnand %p960_p1, %p946_p2  ;;  %p968_p5 = scmp.lt.s32.totalorder %s966_s21, %s959_s3 }
  0x36   : > { %p963_p12 = pneg %p962_p3  ;;  %p969_p6 = por %p968_p5, %p967_p9 }
  0x38   : > { %p970_p7 = pnand %p969_p6, %p963_p12 }
  0x3a   : > { %973 = shalt.err (!%p970_p7)
}
  0x3b   : > { %s1109_s4 = smov 128   ;;  %s1110_s6 = smov 8  }
  0x3c   : > { %866 = dma.hbm_to_vmem [thread:$0]  (!%p1224_p0), %s1233_s26, 2048, %s1219_s7, %s169_s27, %s1109_s4, %s1109_s4, %s1110_s6  }
  0x3d   : > { %p711_p9 = scmp.ge.s32.totalorder %s1106_s16, 1  ;;  %p218_p12 = scmp.lt.s32.totalorder %s1106_s16, 9 }
  0x3e   : > { %s1277_s5 = scalar_lea.hbm %s1450_s1, %s706_s17  ;;  %s1465_s21 = sshll.u32 %s1207_s29, 7 }
  0x3f   : > { %p1268_p4 = pnand %p711_p9, %p218_p12  ;;  %s198_s0 = scalar_lea.vmem [#allocation6], %s1465_s21 }
  0x40   : > { %s210_s20 = sshll.u32 %s198_s0, 4  ;;  %s195_s7 = scalar_lea.sflag [#allocation7], %s1207_s29  ;;  %s1281_s20 = int_to_ptr.vmem [resolvable:$true] %s210_s20 }
  0x41   : > { %s974_s26 = scalar_lea.hbm %s1277_s5, 2048  ;;  %s979_s17 = scalar_lea.hbm %s1450_s1, 16384 }
  0x42   : > { %p975_p10 = scmp.ne.s32.totalorder %s1277_s5, %s974_s26  ;;  %p980_p1 = scmp.lt.u32.totalorder %s1277_s5, %s1450_s1 }
  0x43   : > { %p981_p3 = scmp.lt.u32.totalorder %s979_s17, %s974_s26  ;;  %p983_p6 = scmp.lt.u32.totalorder %s974_s26, %s1277_s5 }
  0x44   : > { %p977_p11 = pnand %p975_p10, %p946_p2 }
  0x45   : > { %p982_p5 = por %p981_p3, %p980_p1 }
  0x46   : > { %p978_p13 = pneg %p977_p11 }
  0x47   : > { %p984_p7 = por %p983_p6, %p982_p5 }
  0x49   : > { %p985_p9 = pnand %p984_p7, %p978_p13 }
  0x4b   : > { %988 = shalt.err (!%p985_p9)
}
  0x4c   : > { %s989_s0 = scalar_lea.vmem %s1281_s20, 2048  ;;  %s1111_s21 = smov [#allocation6]  }
  0x4d   : > { %p990_p12 = scmp.ne.s32.totalorder %s1281_s20, %s989_s0  ;;  %s994_s8 = sshll.u32 %s1111_s21, 4  ;;  %s995_s8 = int_to_ptr.vmem [resolvable:$false] %s994_s8 }
  0x4e   : > { %s996_s27 = scalar_lea.vmem %s995_s8, 4096  ;;  %p997_p8 = scmp.lt.s32.totalorder %s1281_s20, %s995_s8 }
  0x4f   : > { %p992_p10 = pnand %p990_p12, %p946_p2  ;;  %p998_p1 = scmp.lt.s32.totalorder %s996_s27, %s989_s0 }
  0x51   : > { %p993_p11 = pneg %p992_p10  ;;  %p999_p3 = por %p998_p1, %p997_p8 }
  0x53   : > { %p1000_p5 = pnand %p999_p3, %p993_p11 }
  0x55   : > { %1003 = shalt.err (!%p1000_p5)
}
  0x56   : > { %869 = dma.hbm_to_vmem [thread:$0]  (!%p1224_p0), %s1277_s5, 2048, %s1281_s20, %s195_s7, %s1109_s4, %s1109_s4, %s1110_s6  }
  0x57   : > { %222 = sbr.rel (%p1268_p4) target bundleno = 372 (0x174), region = 28  ;;  %s1315_s26 = sand.u32 (!%p1268_p4), 1, %s1082_s10  }
  0x58   : > { %s1318_s17 = sshll.u32 (!%p1268_p4), %s1315_s26, 7  ;;  %s225_s18 = scalar_lea.sflag (!%p1268_p4), [#allocation4], %s1315_s26 }
  0x59   : > { %s1322_s22 = scalar_lea.vmem (!%p1268_p4), [#allocation3], %s1318_s17  ;;  %p1466_p8 = scmp.ne.s32.totalorder (!%p1268_p4), %s1459_s24, 0 }
  0x5e   : > { %1065 = dma.done.wait (%p1466_p8), %s225_s18, 2048  }
  0x5f   : > { %1067 = vsyncadd (%p1466_p8), %s225_s18, 4294965248  ;;  %s234_s20 = scalar_lea.sflag [#allocation7], %s1315_s26  ;;  %s1330_s29 = scalar_lea.vmem [#allocation6], %s1318_s17 }
  0x60   : > { %1069 = dma.done.wait (%p1466_p8), %s234_s20, 2048  }
  0x61   : > { %1071 = vsyncadd (%p1466_p8), %s234_s20, 4294965248  ;;  %v318_v0 = vld [vmem:[%s1330_s29] sm:$0xff]  ;;  %v319_v1 = vld [vmem:[%s1330_s29 + $0x8] sm:$0xff]  ;;  %s1369_s24 = scalar_lea.vmem [#allocation8], %s1318_s17  ;;  %s716_s4 = sshll.u32 %s1090_s12, 4 }
  0x62   : > { %v320_v2 = vld [vmem:[%s1330_s29 + $0x10] sm:$0xff]  ;;  %v809_v3 = vpack.c.bf16 %v319_v1, %v318_v0  ;;  %v321_v4 = vld [vmem:[%s1330_s29 + $0x18] sm:$0xff]  ;;  %v322_v6 = vld [vmem:[%s1330_s29 + $0x20] sm:$0xff]  ;;  %s717_s6 = sshll.u32 %s1094_s13, 6  ;;  %s565_s12 = sshll.u32 %s1369_s24, 4  ;;  %s1391_s12 = int_to_ptr.vmem [resolvable:$true] %s565_s12 }
  0x63   : > { %v813_v5 = vpack.c.bf16 %v321_v4, %v320_v2  ;;  %v323_v7 = vld [vmem:[%s1330_s29 + $0x28] sm:$0xff]  ;;  %v302_v9 = vld [vmem:[%s1322_s22] sm:$0xff]  ;;  %v324_v11 = vld [vmem:[%s1330_s29 + $0x30] sm:$0xff]  ;;  %s562_s3 = sadd.s32 %s717_s6, %s716_s4  ;;  %s547_s0 = scalar_lea.sflag [#allocation5], %s1315_s26 }
  0x64   : > { %810 = vmatprep.subr.bf16.mxu0 %v809_v3  ;;  %841 = vmatprep.subr.bf16.mxu1 %v809_v3  ;;  %v817_v8 = vpack.c.bf16 %v323_v7, %v322_v6  ;;  %v310_v10 = vld [vmem:[%s1322_s22 + $0x40] sm:$0xff]  ;;  %v325_v12 = vld [vmem:[%s1330_s29 + $0x38] sm:$0xff]  ;;  %v327_v15 = vld [vmem:[%s1330_s29 + $0x48] sm:$0xff]  ;;  %s718_s5 = sshll.u32 %s562_s3, 7  ;;  %s1004_s21 = scalar_lea.vmem %s1391_s12, 2048 }
  0x65   : > { %812 = vmatpush3.bf16.msra.mxu0 %v809_v3  ;;  %849 = vmatpush3.bf16.msra.mxu1 %v809_v3  ;;  %v821_v13 = vpack.c.bf16 %v325_v12, %v324_v11  ;;  %v326_v14 = vld [vmem:[%s1330_s29 + $0x40] sm:$0xff]  ;;  %v328_v17 = vld [vmem:[%s1330_s29 + $0x50] sm:$0xff]  ;;  %v329_v18 = vld [vmem:[%s1330_s29 + $0x58] sm:$0xff]  ;;  %s1389_s23 = scalar_lea.hbm %s1451_s2, %s718_s5  ;;  %p1005_p0 = scmp.ne.s32.totalorder %s1391_s12, %s1004_s21 }
  0x66   : > { %814 = vmatprep.subr.bf16.mxu0 %v813_v5  ;;  %842 = vmatprep.subr.bf16.mxu1 %v813_v5  ;;  %v825_v16 = vpack.c.bf16 %v327_v15, %v326_v14  ;;  %v829_v19 = vpack.c.bf16 %v329_v18, %v328_v17  ;;  %v330_v20 = vld [vmem:[%s1330_s29 + $0x60] sm:$0xff]  ;;  %v331_v21 = vld [vmem:[%s1330_s29 + $0x68] sm:$0xff]  ;;  %v332_v23 = vld [vmem:[%s1330_s29 + $0x70] sm:$0xff]  ;;  %p1467_p2 = scmp.ne.s32.totalorder %s1460_s25, 0  ;;  %s1112_s8 = smov [#allocation8]  }
  0x67   : > { %785 = vmatprep.mubr.f32.mxu0 %v302_v9  ;;  %797 = vmatprep.mubr.f32.mxu1 %v310_v10  ;;  %v833_v22 = vpack.c.bf16 %v331_v21, %v330_v20  ;;  %v333_v24 = vld [vmem:[%s1330_s29 + $0x78] sm:$0xff]  ;;  %v303_v26 = vld [vmem:[%s1322_s22 + $0x8] sm:$0xff]  ;;  %v304_v28 = vld [vmem:[%s1322_s22 + $0x10] sm:$0xff]  ;;  %s1008_s27 = sshll.u32 %s1112_s8, 4  ;;  %s1009_s27 = int_to_ptr.vmem [resolvable:$false] %s1008_s27 }
  0x68   : > { %v837_v25 = vpack.c.bf16 %v333_v24, %v332_v23  ;;  %v311_v27 = vld [vmem:[%s1322_s22 + $0x48] sm:$0xff]  ;;  %v312_v29 = vld [vmem:[%s1322_s22 + $0x50] sm:$0xff]  ;;  %v305_v30 = vld [vmem:[%s1322_s22 + $0x18] sm:$0xff]  ;;  %p1006_p4 = pnand %p1005_p0, %p1467_p2  ;;  %s1010_s17 = scalar_lea.vmem %s1009_s27, 4096 }
  0x69   : > { %816 = vmatpush3.bf16.msra.mxu0 %v813_v5  ;;  %850 = vmatpush3.bf16.msra.mxu1 %v813_v5  ;;  %v313_v31 = vld [vmem:[%s1322_s22 + $0x58] sm:$0xff]  ;;  %v306_v32 = vld [vmem:[%s1322_s22 + $0x20] sm:$0xff]  ;;  %v307_v34 = vld [vmem:[%s1322_s22 + $0x28] sm:$0xff]  ;;  %p1011_p6 = scmp.lt.s32.totalorder %s1391_s12, %s1009_s27  ;;  %p1012_p7 = scmp.lt.s32.totalorder %s1010_s17, %s1004_s21 }
  0x6a   : > { %818 = vmatprep.subr.bf16.mxu0 %v817_v8  ;;  %843 = vmatprep.subr.bf16.mxu1 %v817_v8  ;;  %v314_v33 = vld [vmem:[%s1322_s22 + $0x60] sm:$0xff]  ;;  %v315_v35 = vld [vmem:[%s1322_s22 + $0x68] sm:$0xff]  ;;  %v308_v36 = vld [vmem:[%s1322_s22 + $0x30] sm:$0xff]  ;;  %p1007_p13 = pneg %p1006_p4 }
  0x6b   : > { %v316_v37 = vld [vmem:[%s1322_s22 + $0x70] sm:$0xff]  ;;  %v309_v38 = vld [vmem:[%s1322_s22 + $0x38] sm:$0xff]  ;;  %p1013_p9 = por %p1012_p7, %p1011_p6 }
  0x6c   : > { %v317_v39 = vld [vmem:[%s1322_s22 + $0x78] sm:$0xff] }
  0x6d   : > { %820 = vmatpush3.bf16.msra.mxu0 %v817_v8  ;;  %851 = vmatpush3.bf16.msra.mxu1 %v817_v8  ;;  %p1014_p12 = pnand %p1013_p9, %p1007_p13 }
  0x6e   : > { %822 = vmatprep.subr.bf16.mxu0 %v821_v13  ;;  %844 = vmatprep.subr.bf16.mxu1 %v821_v13 }
  0x71   : > { %824 = vmatpush3.bf16.msra.mxu0 %v821_v13  ;;  %852 = vmatpush3.bf16.msra.mxu1 %v821_v13 }
  0x72   : > { %826 = vmatprep.subr.bf16.mxu0 %v825_v16  ;;  %845 = vmatprep.subr.bf16.mxu1 %v825_v16 }
  0x75   : > { %828 = vmatpush3.bf16.msra.mxu0 %v825_v16  ;;  %853 = vmatpush3.bf16.msra.mxu1 %v825_v16 }
  0x76   : > { %830 = vmatprep.subr.bf16.mxu0 %v829_v19  ;;  %846 = vmatprep.subr.bf16.mxu1 %v829_v19 }
  0x79   : > { %832 = vmatpush3.bf16.msra.mxu0 %v829_v19  ;;  %854 = vmatpush3.bf16.msra.mxu1 %v829_v19 }
  0x7a   : > { %834 = vmatprep.subr.bf16.mxu0 %v833_v22  ;;  %847 = vmatprep.subr.bf16.mxu1 %v833_v22 }
  0x7d   : > { %836 = vmatpush3.bf16.msra.mxu0 %v833_v22  ;;  %855 = vmatpush3.bf16.msra.mxu1 %v833_v22 }
  0x7e   : > { %838 = vmatprep.subr.bf16.mxu0 %v837_v25  ;;  %848 = vmatprep.subr.bf16.mxu1 %v837_v25 }
  0x81   : > { %840 = vmatpush3.bf16.msra.mxu0 %v837_v25  ;;  %856 = vmatpush3.bf16.msra.mxu1 %v837_v25 }
  0x84   : > { %786 = vmatmul.mubr.f32.vlgmr.msra.gmra.mrb[0].mxu0 %v303_v26  ;;  %798 = vmatmul.mubr.f32.vlgmr.msra.gmra.mrb[0].mxu1 %v311_v27 }
  0x85   : > { %788 = vmatprep.mubr.f32.mxu0 %v304_v28  ;;  %800 = vmatprep.mubr.f32.mxu1 %v312_v29 }
  0x88   : > { %789 = vmatmul.mubr.f32.gmra.mrb[2].mxu0 %v305_v30  ;;  %801 = vmatmul.mubr.f32.gmra.mrb[2].mxu1 %v313_v31 }
  0x89   : > { %791 = vmatprep.mubr.f32.mxu0 %v306_v32  ;;  %803 = vmatprep.mubr.f32.mxu1 %v314_v33 }
  0x8c   : > { %792 = vmatmul.mubr.f32.gmra.mrb[4].mxu0 %v307_v34  ;;  %804 = vmatmul.mubr.f32.gmra.mrb[4].mxu1 %v315_v35 }
  0x8d   : > { %794 = vmatprep.mubr.f32.mxu0 %v308_v36  ;;  %806 = vmatprep.mubr.f32.mxu1 %v316_v37 }
  0x90   : > { %795 = vmatmul.mubr.f32.gmra.mrb[6].mxu0 %v309_v38  ;;  %807 = vmatmul.mubr.f32.gmra.mrb[6].mxu1 %v317_v39 }
 0x157   : > { %v787_v40 = vpop.f32.mrb[0].mxu0  ;;  %v799_v41 = vpop.f32.mrb[0].mxu1 }
 0x158   : > { %531 = vst [vmem:[%s1369_s24 + $0x8] sm:$0xff] %v787_v40  ;;  %539 = vst [vmem:[%s1369_s24 + $0x48] sm:$0xff] %v799_v41  ;;  %v400_v42 = vpop.f32.mrb[1].mxu0  ;;  %v440_v43 = vpop.f32.mrb[1].mxu1 }
 0x159   : > { %530 = vst [vmem:[%s1369_s24] sm:$0xff] %v400_v42  ;;  %538 = vst [vmem:[%s1369_s24 + $0x40] sm:$0xff] %v440_v43 }
 0x15b   : > { %v790_v44 = vpop.f32.mrb[2].mxu0  ;;  %v802_v45 = vpop.f32.mrb[2].mxu1 }
 0x15c   : > { %533 = vst [vmem:[%s1369_s24 + $0x18] sm:$0xff] %v790_v44  ;;  %541 = vst [vmem:[%s1369_s24 + $0x58] sm:$0xff] %v802_v45  ;;  %v410_v46 = vpop.f32.mrb[3].mxu0  ;;  %v450_v47 = vpop.f32.mrb[3].mxu1 }
 0x15d   : > { %532 = vst [vmem:[%s1369_s24 + $0x10] sm:$0xff] %v410_v46  ;;  %540 = vst [vmem:[%s1369_s24 + $0x50] sm:$0xff] %v450_v47 }
 0x15f   : > { %v793_v48 = vpop.f32.mrb[4].mxu0  ;;  %v805_v49 = vpop.f32.mrb[4].mxu1 }
 0x160   : > { %535 = vst [vmem:[%s1369_s24 + $0x28] sm:$0xff] %v793_v48  ;;  %543 = vst [vmem:[%s1369_s24 + $0x68] sm:$0xff] %v805_v49  ;;  %v420_v50 = vpop.f32.mrb[5].mxu0  ;;  %v460_v51 = vpop.f32.mrb[5].mxu1 }
 0x161   : > { %534 = vst [vmem:[%s1369_s24 + $0x20] sm:$0xff] %v420_v50  ;;  %542 = vst [vmem:[%s1369_s24 + $0x60] sm:$0xff] %v460_v51 }
 0x163   : > { %v796_v52 = vpop.f32.mrb[6].mxu0  ;;  %v808_v53 = vpop.f32.mrb[6].mxu1 }
 0x164   : > { %537 = vst [vmem:[%s1369_s24 + $0x38] sm:$0xff] %v796_v52  ;;  %545 = vst [vmem:[%s1369_s24 + $0x78] sm:$0xff] %v808_v53  ;;  %v430_v54 = vpop.f32.mrb[7].mxu0  ;;  %v470_v55 = vpop.f32.mrb[7].mxu1 }
 0x165   : > { %536 = vst [vmem:[%s1369_s24 + $0x30] sm:$0xff] %v430_v54  ;;  %544 = vst [vmem:[%s1369_s24 + $0x70] sm:$0xff] %v470_v55 }
 0x166   : > { %1017 = shalt.err (!%p1014_p12)
}
 0x167   : > { %s1018_s18 = scalar_lea.hbm %s1389_s23, 2048  ;;  %s1022_s29 = scalar_lea.hbm %s1451_s2, 16384 }
 0x168   : > { %p1019_p10 = scmp.ne.s32.totalorder %s1389_s23, %s1018_s18  ;;  %p1023_p3 = scmp.lt.u32.totalorder %s1389_s23, %s1451_s2 }
 0x169   : > { %p1024_p5 = scmp.lt.u32.totalorder %s1022_s29, %s1018_s18  ;;  %p1026_p0 = scmp.lt.u32.totalorder %s1018_s18, %s1389_s23 }
 0x16a   : > { %p1020_p11 = pnand %p1019_p10, %p1467_p2 }
 0x16b   : > { %p1025_p8 = por %p1024_p5, %p1023_p3 }
 0x16c   : > { %p1021_p1 = pneg %p1020_p11 }
 0x16d   : > { %p1027_p4 = por %p1026_p0, %p1025_p8 }
 0x16f   : > { %p1028_p13 = pnand %p1027_p4, %p1021_p1 }
 0x171   : > { %1031 = shalt.err (!%p1028_p13)
}
 0x172   : > { %s1113_s6 = smov 128   ;;  %s1114_s3 = smov 8  }
 0x173   : > { %861 = dma.vmem_to_hbm [thread:$0]  (%p1467_p2), %s1391_s12, 2048, %s1389_s23, %s547_s0, %s1113_s6, %s1113_s6, %s1114_s3  }
 0x174 PF: > { %p875_p6 = scmp.ge.s32.totalorder %s1106_s16, 2  ;;  %s580_s5 = sand.u32 1, %s1078_s9  }
 0x175   : > { %p1468_p7 = scmp.ne.s32.totalorder %s1461_s28, 0  ;;  %s581_s13 = scalar_lea.sflag [#allocation5], %s580_s5 }
 0x177   : > { %p871_p9 = pnand %p875_p6, %p1468_p7 }
 0x179   : > { %1073 = dma.done.wait (!%p871_p9), %s581_s13, 2048  }
 0x17a   : > { %1075 = vsyncadd (!%p871_p9), %s581_s13, 4294965248  ;;  %s21_s16 = sadd.s32 1, %s1106_s16   ;;  %s1469_s25 = sld [smem:[#allocation12_spill]] }
 0x17b   : > { %p18_p12 = scmp.ge.s32.totalorder %s21_s16, 10   ;;  %s1470_s9 = smov %s1082_s10 }
 0x17c   : > { %s1471_s10 = smov %s1086_s11  ;;  %s1472_s11 = smov %s1210_s30 }
 0x17d   : > { %s1473_s12 = smov %s1098_s14  ;;  %s1474_s13 = smov %s1102_s15 }
 0x17e   : > { %s1475_s14 = smov %s1478_s19  ;;  %20 = sbr.rel (!%p18_p12) target bundleno = 11 (0xb), region = 94 }
 0x180   : > { %s1476_s15 = smov %s1469_s25 }
 0x185   :  { %586 = vsyncpa [#allocation4], 1 }
 0x186   :  { %588 = vsyncpa [#allocation4 + $0x1], 1 }
 0x187   :  { %589 = vsyncpa [#allocation7], 1 }
 0x188   :  { %591 = vsyncpa [#allocation7 + $0x1], 1 }
 0x189   :  { %592 = vsyncpa [#allocation5], 1 }
 0x18a   :  { %594 = vsyncpa [#allocation5 + $0x1], 1 }

</bundles_post_ra>
